<compile_context>
chip_gen: v7x
topology: tpu7x:2x2x1
jax: 0.10.0
libtpu: 0.0.40
codegen_flags: <defaults>
</compile_context>

<pallas_src>
import jax
import jax.numpy as jnp
from jax.experimental import pallas as pl
from jax.experimental.pallas import tpu as pltpu


def _film_kernel(x_ref, w_ref, freq_ref, beta_ref, o_ref):
    # x_ref:    (1, TILE_N, D_in)   one batch element's tile of points
    # w_ref:    (D_in, D_h_p)       full (padded) weight, VMEM-resident
    # freq_ref: (1, 1, D_h_p)       per-batch FiLM frequency
    # beta_ref: (1, 1, D_h_p)       per-batch fused bias+phase (f*b + p)
    # o_ref:    (1, TILE_N, D_h_p)
    x = x_ref[0]                                              # (TILE_N, D_in)
    w = w_ref[...]                                            # (D_in, D_h_p)
    h = jnp.dot(x, w, preferred_element_type=jnp.float32)     # MXU, f32 acc
    freq = freq_ref[0]                                        # (1, D_h_p) -> bcast over rows
    beta = beta_ref[0]                                        # (1, D_h_p)
    o_ref[0] = jnp.sin(h * freq + beta).astype(o_ref.dtype)


def _round_up(v, m):
    return ((v + m - 1) // m) * m


def film_layer(x, w_t, b, freq, phase_shift, *, tile_n=512,
               matmul_dtype=None, out_dtype=None):
    """FiLM layer forward.

    x: (B, N, D_in); w_t: (D_in, D_h) (pre-transposed nn.Linear weight);
    b: (D_h,); freq / phase_shift: (B, D_h).  Returns (B, N, D_h).

    tile_n:       N-tile size (rounded to a multiple of 8).
    matmul_dtype: e.g. jnp.bfloat16 to run MXU operands in bf16 (f32 accumulate).
    out_dtype:    output dtype (defaults to x.dtype).
    """
    B, N, D_in = x.shape
    D_h = w_t.shape[1]
    out_dtype = jnp.dtype(out_dtype) if out_dtype is not None else jnp.dtype(x.dtype)

    # Fold the bias into the phase term (f32): beta = freq * b + phase_shift.
    freq_f32 = freq.astype(jnp.float32)
    beta = freq_f32 * b.astype(jnp.float32)[None, :] + phase_shift.astype(jnp.float32)

    # Pad hidden dim to a multiple of 128 for lane-dense MXU output / stores.
    D_h_p = _round_up(D_h, 128)
    if D_h_p != D_h:
        w_t = jnp.pad(w_t, ((0, 0), (0, D_h_p - D_h)))
        freq_f32 = jnp.pad(freq_f32, ((0, 0), (0, D_h_p - D_h)))
        beta = jnp.pad(beta, ((0, 0), (0, D_h_p - D_h)))

    # Optional low-precision MXU operands (HBM traffic also shrinks).
    if matmul_dtype is not None:
        x_mm = x.astype(matmul_dtype)
        w_mm = w_t.astype(matmul_dtype)
    else:
        x_mm = x
        w_mm = w_t

    # Batch axis kept outside the last-two dims of the per-batch vectors so their
    # blocks are (1, 1, D_h_p) with a full-extent sublane dim.
    freq3 = freq_f32.reshape(B, 1, D_h_p)
    beta3 = beta.reshape(B, 1, D_h_p)

    # Tile over N; pad N up to a multiple of the (8-aligned) tile.
    tile_n = max(8, _round_up(min(tile_n, max(N, 1)), 8))
    N_p = _round_up(N, tile_n)
    if N_p != N:
        x_mm = jnp.pad(x_mm, ((0, 0), (0, N_p - N), (0, 0)))
    n_tiles = N_p // tile_n

    # VMEM budget: x + out double-buffered, weight (possibly) double-buffered,
    # plus the tiny per-batch vectors; generous 2x headroom, clamped.
    vmem_est = (2 * tile_n * D_in * jnp.dtype(x_mm.dtype).itemsize
                + 2 * D_in * D_h_p * jnp.dtype(w_mm.dtype).itemsize
                + 2 * tile_n * D_h_p * out_dtype.itemsize
                + 8 * D_h_p * 4)
    vmem_limit = int(min(100 * 1024 * 1024, max(32 * 1024 * 1024, 2 * vmem_est)))

    out = pl.pallas_call(
        _film_kernel,
        out_shape=jax.ShapeDtypeStruct((B, N_p, D_h_p), out_dtype),
        grid_spec=pltpu.PrefetchScalarGridSpec(
            num_scalar_prefetch=0,
            grid=(B, n_tiles),
            in_specs=[
                pl.BlockSpec((1, tile_n, D_in), lambda bi, ni: (bi, ni, 0)),  # x tile
                pl.BlockSpec((D_in, D_h_p), lambda bi, ni: (0, 0)),           # weight (resident)
                pl.BlockSpec((1, 1, D_h_p), lambda bi, ni: (bi, 0, 0)),       # freq
                pl.BlockSpec((1, 1, D_h_p), lambda bi, ni: (bi, 0, 0)),       # beta
            ],
            out_specs=pl.BlockSpec((1, tile_n, D_h_p), lambda bi, ni: (bi, ni, 0)),
        ),
        compiler_params=pltpu.CompilerParams(
            dimension_semantics=("parallel", "parallel"),
            vmem_limit_bytes=vmem_limit,
        ),
    )(x_mm, w_mm, freq3, beta3)

    # Strip N / D_h padding.
    return out[:, :N, :D_h]


def film_layer_ref(x, w_t, b, freq, phase_shift):
    """Plain-JAX reference mirroring the PyTorch forward."""
    h = jnp.einsum("bnd,dh->bnh", x, w_t) + b
    return jnp.sin(freq[:, None, :] * h + phase_shift[:, None, :])


if __name__ == "__main__":
    B, N, D_in, D_h = 2, 8, 32, 32

    key = jax.random.PRNGKey(0)
    kx, kw, kb, kf, kp = jax.random.split(key, 5)

    # Deterministic "nn.Linear(input_dim, hidden_dim)" params:
    # PyTorch inits uniform(-1/sqrt(D_in), 1/sqrt(D_in)); reproduce that bound.
    bound = 1.0 / (D_in ** 0.5)
    w_t = jax.random.uniform(kw, (D_in, D_h), jnp.float32, -bound, bound)  # W^T
    b = jax.random.uniform(kb, (D_h,), jnp.float32, -bound, bound)

    x = jax.random.normal(kx, (B, N, D_in), jnp.float32)
    freq = jax.random.normal(kf, (B, D_h), jnp.float32) * 15.0 + 30.0
    phase_shift = jax.random.normal(kp, (B, D_h), jnp.float32)

    # Default (f32) path — exact match against the reference.
    out = film_layer(x, w_t, b, freq, phase_shift)
    out = jax.block_until_ready(out)
    ref = film_layer_ref(x, w_t, b, freq, phase_shift)
    assert out.shape == (B, N, D_h)
    assert jnp.allclose(out, ref, atol=1e-4, rtol=1e-4), "mismatch vs reference (f32 path)"

    # bf16 MXU-operand + bf16-output path (v6e/v7x fast path) — smoke test.
    # Note: with |freq| ~ 30-45 the sin amplifies matmul rounding, so only a loose
    # sanity check is meaningful here.
    out_bf16 = film_layer(x, w_t, b, freq, phase_shift,
                          matmul_dtype=jnp.bfloat16, out_dtype=jnp.bfloat16)
    out_bf16 = jax.block_until_ready(out_bf16)
    assert out_bf16.shape == (B, N, D_h)
    assert bool(jnp.all(jnp.isfinite(out_bf16.astype(jnp.float32))))
    assert bool(jnp.all(jnp.abs(out_bf16.astype(jnp.float32)) <= 1.0 + 1e-2))

    print("KERNEL_OK")
</pallas_src>

<mosaic_0001>
module attributes {stable_mosaic.version = 11 : i64} {
  func.func @_film_kernel(%arg0: i32, %arg1: i32, %arg2: memref<1x8x32xf32, #tpu.memory_space<vmem>>, %arg3: memref<32x128xf32, #tpu.memory_space<vmem>>, %arg4: memref<1x1x128xf32, #tpu.memory_space<vmem>>, %arg5: memref<1x1x128xf32, #tpu.memory_space<vmem>>, %arg6: memref<1x8x128xf32, #tpu.memory_space<vmem>>) attributes {dimension_semantics = [#tpu.dimension_semantics<parallel>, #tpu.dimension_semantics<parallel>], iteration_bounds = array<i64: 2, 1>, scalar_prefetch = 0 : i64, scratch_operands = 0 : i64, tpu.core_type = #tpu.core_type<tc>, window_params = [{transform_indices = @transform_0, window_bounds = array<i64: 1, 8, 32>}, {pipeline_mode = #tpu.pipeline_mode<synchronous>, transform_indices = @transform_1, window_bounds = array<i64: 32, 128>}, {transform_indices = @transform_2, window_bounds = array<i64: 1, 1, 128>}, {transform_indices = @transform_3, window_bounds = array<i64: 1, 1, 128>}, {transform_indices = @transform_4, window_bounds = array<i64: 1, 8, 128>}]} {
    %c0 = arith.constant 0 : index
    %c0_0 = arith.constant 0 : index
    %c0_1 = arith.constant 0 : index
    %0 = vector.load %arg2[%c0, %c0_0, %c0_1] : memref<1x8x32xf32, #tpu.memory_space<vmem>>, vector<1x8x32xf32>
    %1 = vector.shape_cast %0 : vector<1x8x32xf32> to vector<8x32xf32>
    %c0_2 = arith.constant 0 : index
    %c0_3 = arith.constant 0 : index
    %2 = vector.load %arg3[%c0_2, %c0_3] : memref<32x128xf32, #tpu.memory_space<vmem>>, vector<32x128xf32>
    %cst = arith.constant dense<0.000000e+00> : vector<8x128xf32>
    %3 = tpu.matmul %1, %2, %cst {dimension_numbers = #tpu.dot_dimension_numbers<[1], [0], [0], [1], [0, 0, 1, 1], [], []>} : vector<8x32xf32>, vector<32x128xf32>, vector<8x128xf32> -> vector<8x128xf32>
    %c0_4 = arith.constant 0 : index
    %c0_5 = arith.constant 0 : index
    %c0_6 = arith.constant 0 : index
    %4 = vector.load %arg4[%c0_4, %c0_5, %c0_6] : memref<1x1x128xf32, #tpu.memory_space<vmem>>, vector<1x1x128xf32>
    %5 = vector.shape_cast %4 : vector<1x1x128xf32> to vector<1x128xf32>
    %c0_7 = arith.constant 0 : index
    %c0_8 = arith.constant 0 : index
    %c0_9 = arith.constant 0 : index
    %6 = vector.load %arg5[%c0_7, %c0_8, %c0_9] : memref<1x1x128xf32, #tpu.memory_space<vmem>>, vector<1x1x128xf32>
    %7 = vector.shape_cast %6 : vector<1x1x128xf32> to vector<1x128xf32>
    %8 = vector.broadcast %5 : vector<1x128xf32> to vector<8x128xf32>
    %9 = arith.mulf %3, %8 : vector<8x128xf32>
    %10 = vector.broadcast %7 : vector<1x128xf32> to vector<8x128xf32>
    %11 = arith.addf %9, %10 : vector<8x128xf32>
    %12 = math.sin %11 : vector<8x128xf32>
    %c0_10 = arith.constant 0 : index
    %c0_11 = arith.constant 0 : index
    %c0_12 = arith.constant 0 : index
    %13 = vector.load %arg6[%c0_10, %c0_11, %c0_12] : memref<1x8x128xf32, #tpu.memory_space<vmem>>, vector<1x8x128xf32>
    %14 = vector.shape_cast %13 : vector<1x8x128xf32> to vector<8x128xf32>
    %15 = vector.shape_cast %12 : vector<8x128xf32> to vector<1x8x128xf32>
    tpu.vector_store %arg6[%c0_10, %c0_11, %c0_12], %15 {strides = array<i32>} : memref<1x8x128xf32, #tpu.memory_space<vmem>>, vector<1x8x128xf32>,
    return
  }
  func.func @transform_0(%arg0: i32, %arg1: i32) -> (i32, i32, i32) {
    %c0_i32 = arith.constant 0 : i32
    %c0_i32_0 = arith.constant 0 : i32
    return %arg0, %arg1, %c0_i32 : i32, i32, i32
  }
  func.func @transform_1(%arg0: i32, %arg1: i32) -> (i32, i32) {
    %c0_i32 = arith.constant 0 : i32
    %c0_i32_0 = arith.constant 0 : i32
    %c0_i32_1 = arith.constant 0 : i32
    return %c0_i32, %c0_i32_0 : i32, i32
  }
  func.func @transform_2(%arg0: i32, %arg1: i32) -> (i32, i32, i32) {
    %c0_i32 = arith.constant 0 : i32
    %c0_i32_0 = arith.constant 0 : i32
    %c0_i32_1 = arith.constant 0 : i32
    return %arg0, %c0_i32, %c0_i32_0 : i32, i32, i32
  }
  func.func @transform_3(%arg0: i32, %arg1: i32) -> (i32, i32, i32) {
    %c0_i32 = arith.constant 0 : i32
    %c0_i32_0 = arith.constant 0 : i32
    %c0_i32_1 = arith.constant 0 : i32
    return %arg0, %c0_i32, %c0_i32_0 : i32, i32, i32
  }
  func.func @transform_4(%arg0: i32, %arg1: i32) -> (i32, i32, i32) {
    %c0_i32 = arith.constant 0 : i32
    %c0_i32_0 = arith.constant 0 : i32
    return %arg0, %arg1, %c0_i32 : i32, i32, i32
  }
}

</mosaic_0001>

<bundles_post_ra>
// kernel: tpu_custom_call.1
= control target key start
LH: loop header
LB: loop body
LE: loop exit
PB: predicated region body
PF: predicated region fallthrough
CT: control target
= control target key end

     0   :  { %9 = vsyncpa [#allocation3], 0  ;;  %s1164_s0 = inlined_call_operand.hbm [shape: f32[2,8,32], index: 0, kind: input, shape index: {}]   ;;  %s1165_s1 = inlined_call_operand.hbm [shape: f32[32,128], index: 1, kind: input, shape index: {}]   ;;  %s1166_s2 = inlined_call_operand.vmem [shape: f32[2,1,128], index: 2, kind: input, shape index: {}]   ;;  %s1167_s3 = inlined_call_operand.vmem [shape: f32[2,1,128], index: 3, kind: input, shape index: {}]   ;;  %s1168_s4 = inlined_call_operand.hbm [shape: f32[2,8,128], index: 4, kind: output, shape index: {}]  }
   0x1   :  { %11 = vsyncpa [#allocation3 + $0x1], 0 }
   0x2   :  { %12 = vsyncpa [#allocation6], 0 }
   0x3   :  { %13 = vsyncpa [#allocation4], 0 }
   0x4   :  { %15 = vsyncpa [#allocation4 + $0x1], 0  ;;  %s917_s15 = smov 0   ;;  %s919_s16 = smov 0  }
   0x5   :  { %s921_s17 = smov 0   ;;  %s923_s18 = smov 0  }
   0x6   :  { %s925_s19 = smov 0   ;;  %s927_s20 = smov 0  }
   0x7 LB: > { %s596_s21 = sadd.s32 4294967295, %s876_s20   ;;  %s597_s22 = sadd.s32 4294967294, %s876_s20   ;;  %s876_s20 = sphi %s927_s20, %s21_s20   ;;  %s872_s19 = sphi %s925_s19, %s1192_s19   ;;  %s868_s18 = sphi %s923_s18, %s1191_s18   ;;  %s864_s17 = sphi %s921_s17, %s1190_s17   ;;  %s860_s16 = sphi %s919_s16, %s1189_s16   ;;  %s856_s15 = sphi %s917_s15, %s1188_s15  }
   0x8   : > { %p55_p0 = scmp.ne.s32.totalorder %s860_s16, %s856_s15  ;;  %p951_p1 = scmp.eq.s32.totalorder %s596_s21, 0 }
   0x9   : > { %p955_p2 = scmp.eq.s32.totalorder %s596_s21, 1  ;;  %p160_p3 = scmp.eq.s32.totalorder %s597_s22, 1 }
   0xa   : > { %s1173_s23 = scalar_select %p951_p1, 1, 0 }
   0xb   : > { %s1174_s24 = scalar_select %p955_p2, 1, 0 }
   0xc   : > { %p961_p4 = por %p951_p1, %p55_p0  ;;  %p598_p5 = scmp.ge.s32.totalorder %s876_s20, 1 }
   0xd   : > { %p966_p6 = por %p160_p3, %p55_p0  ;;  %p167_p7 = scmp.lt.s32.totalorder %s876_s20, 3 }
   0xe   : > { %s1175_s25 = scalar_select %p961_p4, 1, 0 }
   0xf   : > { %s1176_s26 = scalar_select %p966_p6, 1, 0 }
  0x10   : > { %p971_p8 = pnand %p598_p5, %p167_p7  ;;  %s878_s28 = smov [#allocation5]  }
  0x11   : > { %s179_s29 = sshll.u32 %s878_s28, 4  ;;  %s33_s5 = sadd.s32 1, %s872_s19  ;;  %s180_s29 = int_to_ptr.vmem [resolvable:$true] %s179_s29 }
  0x12   : > { %s1177_s27 = scalar_select %p971_p8, 1, 0 }
  0x13   : > { %p652_p9 = pneg %p971_p8  ;;  %s732_s8 = scalar_lea.hbm %s1165_s1, 512 }
  0x14   : > { %p733_p12 = scmp.ne.s32.totalorder %s1165_s1, %s732_s8  ;;  %p739_p5 = scmp.lt.u32.totalorder %s732_s8, %s1165_s1 }
  0x15   : > { %p980_p11 = pnand %p652_p9, %p951_p1 }
  0x17   : > { %p734_p13 = pneg %p980_p11 }
  0x19   : > { %p735_p0 = pnand %p734_p13, %p733_p12 }
  0x1b   : > { %p736_p3 = pneg %p735_p0 }
  0x1d   : > { %p741_p7 = pnand %p739_p5, %p736_p3 }
  0x1f   : > { %744 = shalt.err (!%p741_p7)
}
  0x20   : > { %s745_s13 = scalar_lea.vmem %s180_s29, 512  ;;  %p753_p1 = scmp.lt.s32.totalorder %s180_s29, %s180_s29 }
  0x21   : > { %p746_p9 = scmp.ne.s32.totalorder %s180_s29, %s745_s13  ;;  %p754_p4 = scmp.lt.s32.totalorder %s745_s13, %s745_s13 }
  0x23   : > { %p748_p10 = pnand %p746_p9, %p734_p13  ;;  %p755_p8 = por %p754_p4, %p753_p1 }
  0x25   : > { %p749_p6 = pneg %p748_p10 }
  0x27   : > { %p756_p2 = pnand %p755_p8, %p749_p6 }
  0x29   : > { %759 = shalt.err (!%p756_p2)
}
  0x2a   : > { %s879_s14 = smov 128   ;;  %s880_s21 = smov 8  }
  0x2b   : > { %655 = dma.hbm_to_vmem [thread:$0]  (!%p980_p11), %s1165_s1, 512, %s180_s29, [#allocation6], %s879_s14, %s879_s14, %s880_s21  }
  0x2c   : > { %p35_p1 = scmp.ge.s32.totalorder %s33_s5, 2  ;;  %s42_s6 = sadd.s32 1, %s864_s17 }
  0x2d   : > { %p49_p2 = scmp.ne.s32.totalorder %s864_s17, %s860_s16  ;;  %p50_p4 = scmp.eq.s32.totalorder %s876_s20, 0 }
  0x2e   : > { %s1194_s5 = smov (%p35_p1, %s33_s5), 0  ;;  %p1180_p8 = scmp.ne.s32.totalorder %s1174_s24, 0 }
  0x2f   : > { %p1007_p6 = por %p50_p4, %p49_p2  ;;  %s37_s30 = ssub.s32 %s872_s19, %s1194_s5 }
  0x30   : > { %p1013_p10 = por %p1180_p8, %p49_p2  ;;  %p665_p12 = scmp.lt.s32.totalorder %s876_s20, 2 }
  0x31   : > { %p40_p11 = scmp.eq.s32.totalorder %s37_s30, 0  ;;  %s193_s29 = sand.u32 1, %s864_s17  }
  0x32   : > { %s601_s9 = sshll.u32 %s193_s29, 3  ;;  %s602_s11 = sshll.u32 %s872_s19, 7 }
  0x33   : > { %s1022_s10 = scalar_select %p40_p11, %s864_s17, %s42_s6  }
  0x34   : > { %s1028_s14 = scalar_lea.hbm %s1164_s0, %s602_s11  ;;  %s197_s24 = scalar_lea.vmem [#allocation2], %s601_s9 }
  0x35   : > { %s205_s21 = sshll.u32 %s197_s24, 4  ;;  %p1034_p13 = pnand %p665_p12, %p1007_p6  ;;  %s1030_s21 = int_to_ptr.vmem [resolvable:$true] %s205_s21 }
  0x36   : > { %s194_s28 = scalar_lea.sflag [#allocation3], %s193_s29  ;;  %s760_s6 = scalar_lea.hbm %s1028_s14, 128 }
  0x37   : > { %p761_p0 = scmp.ne.s32.totalorder %s1028_s14, %s760_s6  ;;  %p762_p3 = pneg %p1034_p13 }
  0x38   : > { %s765_s11 = scalar_lea.hbm %s1164_s0, 256  ;;  %p766_p9 = scmp.lt.u32.totalorder %s1028_s14, %s1164_s0 }
  0x39   : > { %p763_p5 = pnand %p762_p3, %p761_p0  ;;  %p767_p1 = scmp.lt.u32.totalorder %s765_s11, %s760_s6 }
  0x3a   : > { %p769_p4 = scmp.lt.u32.totalorder %s760_s6, %s1028_s14 }
  0x3b   : > { %p764_p7 = pneg %p763_p5  ;;  %p768_p2 = por %p767_p1, %p766_p9 }
  0x3d   : > { %p770_p6 = por %p769_p4, %p768_p2 }
  0x3f   : > { %p771_p8 = pnand %p770_p6, %p764_p7 }
  0x41   : > { %774 = shalt.err (!%p771_p8)
}
  0x42   : > { %s775_s29 = scalar_lea.vmem %s1030_s21, 128  ;;  %s881_s13 = smov [#allocation2]  }
  0x43   : > { %p776_p12 = scmp.ne.s32.totalorder %s1030_s21, %s775_s29  ;;  %s780_s24 = sshll.u32 %s881_s13, 4  ;;  %s781_s24 = int_to_ptr.vmem [resolvable:$false] %s780_s24 }
  0x44   : > { %s782_s30 = scalar_lea.vmem %s781_s24, 256  ;;  %p783_p5 = scmp.lt.s32.totalorder %s1030_s21, %s781_s24 }
  0x45   : > { %p778_p11 = pnand %p776_p12, %p762_p3  ;;  %p784_p9 = scmp.lt.s32.totalorder %s782_s30, %s775_s29 }
  0x47   : > { %p779_p0 = pneg %p778_p11  ;;  %p785_p1 = por %p784_p9, %p783_p5 }
  0x49   : > { %p786_p2 = pnand %p785_p1, %p779_p0 }
  0x4b   : > { %789 = shalt.err (!%p786_p2)
}
  0x4c   : > { %659 = dma.hbm_to_vmem [thread:$0]  (!%p1034_p13), %s1028_s14, 128, %s1030_s21, %s194_s28  }
  0x4d   : > { %p1183_p7 = scmp.ne.s32.totalorder %s1177_s27, 0 }
  0x4e   : > { %s1066_s6 = sand.u32 (!%p1183_p7), 1, %s860_s16   ;;  %p1184_p3 = scmp.ne.s32.totalorder (!%p1183_p7), %s1175_s25, 0 }
  0x4f   : > { %226 = sbr.rel (%p1183_p7) target bundleno = 410 (0x19a), region = 36  ;;  %s604_s9 = sshll.u32 (!%p1183_p7), %s1066_s6, 3 }
  0x50   : > { %s229_s11 = scalar_lea.sflag (!%p1183_p7), [#allocation3], %s1066_s6  ;;  %s232_s7 = scalar_lea.vmem (!%p1183_p7), [#allocation2], %s604_s9 }
  0x56   : > { %843 = dma.done.wait (%p1184_p3), %s229_s11, 128  }
  0x57   : > { %845 = vsyncadd (%p1184_p3), %s229_s11, 4294967168  ;;  %p1185_p13 = scmp.ne.s32.totalorder %s1173_s23, 0 }
  0x59   : > { %847 = dma.done.wait (%p1185_p13), [#allocation6], 512  }
  0x5a   : > { %849 = vsyncadd (%p1185_p13), [#allocation6], 4294966784  ;;  %v882_v0 = vmov 0.0|0.0   ;;  %vm883_vm0 = vmmov 0   ;;  %v884_v1 = vmov 0.0   ;;  %v274_v2 = vld [vmem:[#allocation5] sm:$0xff] }
  0x5b   : > { %634 = vmatprep.subr.bf16.mxu0 %v882_v0  ;;  %631 = vmatprep.mubr.msk.f32.mxu0 %vm883_vm0, %v884_v1  ;;  %v275_v3 = vld [vmem:[#allocation5 + $0x8] sm:$0xff]  ;;  %v276_v4 = vld [vmem:[#allocation5 + $0x10] sm:$0xff]  ;;  %v277_v6 = vld [vmem:[#allocation5 + $0x18] sm:$0xff]  ;;  %vm278_vm1 = vcmask 261120   ;;  %p267_p4 = scmp.lt.s32.totalorder %s868_s18, 1  ;;  %s615_s12 = sshll.u32 %s868_s18, 7 }
  0x5c   : > { %v635_v5 = vpack.c.bf16 %v275_v3, %v274_v2  ;;  %v638_v7 = vpack.c.bf16 %v277_v6, %v276_v4  ;;  %v273_v8 = vld [vmem:[%s232_s7] sm:$0xff]  ;;  %v885_v25 = vmov 683565275   ;;  %v886_v27 = vmov 2475754826   ;;  %s266_s29 = scalar_lea.vmem [#allocation7], %s604_s9  ;;  %s1115_s11 = scalar_lea.hbm %s1168_s4, %s615_s12 }
  0x5d   : > { %s268_s23 = scalar_select %p267_p4, %s868_s18, 1  ;;  %v887_v30 = vmov 2131351028   ;;  %v888_v33 = vmov 2102212464  }
  0x5e   : > { %636 = vmatpush3.bf16.msra.mxu0 %v635_v5  ;;  %v889_v36 = vmov 920167782   ;;  %v890_v39 = vmov 1326507024   ;;  %s488_s13 = sshll.u32 %s266_s29, 4  ;;  %s474_s18 = scalar_lea.sflag [#allocation4], %s1066_s6  ;;  %s1117_s13 = int_to_ptr.vmem [resolvable:$true] %s488_s13 }
  0x5f   : > { %637 = vmatprep.subr.bf16.mxu0 %v882_v0  ;;  %s269_s14 = scalar_lea.vmem %s1166_s2, %s268_s23  ;;  %s272_s28 = scalar_lea.vmem %s1167_s3, %s268_s23 }
  0x60   : > { %v608_v9 = vld [vmem:[%s269_s14] ss:$0 sm:$0xff]  ;;  %s790_s9 = scalar_lea.vmem %s1117_s13, 128  ;;  %s891_s7 = smov [#allocation7]  }
  0x61   : > { %v609_v11 = vld [vmem:[%s272_s28] ss:$0 sm:$0xff]  ;;  %p791_p6 = scmp.ne.s32.totalorder %s1117_s13, %s790_s9  ;;  %s794_s23 = sshll.u32 %s891_s7, 4  ;;  %s795_s23 = int_to_ptr.vmem [resolvable:$false] %s794_s23 }
  0x62   : > { %639 = vmatpush3.bf16.msra.mxu0 %v638_v7  ;;  %s796_s25 = scalar_lea.vmem %s795_s23, 256  ;;  %p797_p11 = scmp.lt.s32.totalorder %s1117_s13, %s795_s23 }
  0x63   : > { %p792_p8 = pnand %p791_p6, %p1013_p10  ;;  %p798_p0 = scmp.lt.s32.totalorder %s796_s25, %s790_s9 }
  0x65   : > { %632 = vmatmul.mubr.msk.f32.vlgmr.msra.gmra.mrb[0].mxu0 %vm278_vm1, %v273_v8  ;;  %p793_p12 = pneg %p792_p8  ;;  %p799_p5 = por %p798_p0, %p797_p11 }
  0x67   : > { %p800_p9 = pnand %p799_p5, %p793_p12 }
 0x138   : > { %v348_v10 = vpop.f32.mrb[0].mxu0 }
 0x139   : > { %v360_v12 = vmul.f32 %v608_v9, %v348_v10  ;;  %v633_v13 = vpop.f32.mrb[1].mxu0 }
 0x13b   : > { %v1088_v14 = vadd.f32 %v609_v11, %v360_v12 }
 0x13d   : > { %v371_v15 = vand.u32 2139095040, %v1088_v14  ;;  %v368_v19 = vand.u32 2147483647, %v1088_v14  ;;  %vm370_vm9 = vcmp.lt.s32.totalorder %v1088_v14, 0  ;;  %vm460_vm14 = vweird.f32 %v1088_v14 }
 0x13f   : > { %v372_v16 = vshrl.u32 %v371_v15, 23  ;;  %v375_v22 = vand.u32 8388607, %v368_v19  ;;  %vm369_vm10 = vcmp.le.f32.partialorder %v368_v19, 0.7853982 }
 0x141   : > { %v610_v17 = vadd.s32 4294967169, %v372_v16  ;;  %v376_v41 = vor.u32 8388608, %v375_v22 }
 0x143   : > { %v378_v18 = vadd.s32 1, %v610_v17  ;;  %v416_v55 = vshll.u32 %v376_v41, 8 }
 0x145   : > { %vm379_vm2 = vcmp.gt.s32.totalorder %v378_v18, 0 }
 0x146   : > { %v380_v20 = vsel %vm379_vm2, %v378_v18, 0 }
 0x147   : > { %v382_v21 = vand.u32 31, %v380_v20  ;;  %v381_v24 = vshrl.u32 %v380_v20, 5 }
 0x149   : > { %v383_v23 = vsub.s32 32, %v382_v21  ;;  %v385_v26 = vshll.u32 %v885_v25, %v382_v21  ;;  %v388_v28 = vshll.u32 %v886_v27, %v382_v21  ;;  %v391_v32 = vshll.u32 %v887_v30, %v382_v21 }
 0x14a   : > { %v394_v35 = vshll.u32 %v888_v33, %v382_v21  ;;  %v397_v38 = vshll.u32 %v889_v36, %v382_v21  ;;  %vm400_vm3 = vcmp.lt.s32.totalorder %v381_v24, 1  ;;  %vm403_vm4 = vcmp.lt.s32.totalorder %v381_v24, 4 }
 0x14b   : > { %v386_v29 = vshrl.u32 %v886_v27, %v383_v23  ;;  %v389_v31 = vshrl.u32 %v887_v30, %v383_v23  ;;  %v392_v34 = vshrl.u32 %v888_v33, %v383_v23  ;;  %v395_v37 = vshrl.u32 %v889_v36, %v383_v23 }
 0x14c   : > { %v398_v40 = vshrl.u32 %v890_v39, %v383_v23  ;;  %v384_v50 = vshrl.u32 %v885_v25, %v383_v23  ;;  %vm402_vm5 = vcmp.lt.s32.totalorder %v381_v24, 3  ;;  %vm401_vm6 = vcmp.lt.s32.totalorder %v381_v24, 2 }
 0x14d   : > { %v387_v42 = vor.u32 %v386_v29, %v385_v26  ;;  %v390_v43 = vor.u32 %v389_v31, %v388_v28  ;;  %v393_v44 = vor.u32 %v392_v34, %v391_v32  ;;  %v396_v45 = vor.u32 %v395_v37, %v394_v35 }
 0x14e   : > { %v399_v46 = vor.u32 %v398_v40, %v397_v38 }
 0x14f   : > { %v405_v47 = vsel %vm403_vm4, %v393_v44, 2102212464  ;;  %v408_v48 = vsel %vm400_vm3, %v387_v42, %v390_v43  ;;  %v412_v49 = vsel %vm400_vm3, %v390_v43, %v393_v44  ;;  %v409_v51 = vsel %vm403_vm4, %v396_v45, 920167782 }
 0x150   : > { %v413_v52 = vsel %vm403_vm4, %v399_v46, 1326507024  ;;  %v410_v53 = vsel %vm402_vm5, %v393_v44, %v409_v51  ;;  %v404_v56 = vsel %vm400_vm3, %v384_v50, %v387_v42  ;;  %v406_v57 = vsel %vm402_vm5, %v390_v43, %v405_v47 }
 0x151   : > { %v414_v54 = vsel %vm402_vm5, %v396_v45, %v413_v52  ;;  %v411_v58 = vsel %vm401_vm6, %v408_v48, %v410_v53  ;;  %v407_v0 = vsel %vm401_vm6, %v404_v56, %v406_v57 }
 0x152   : > { %v415_v59 = vsel %vm401_vm6, %v412_v49, %v414_v54  ;;  %v1097_v62 = vmul.u32.u64.low %v416_v55, %v411_v58  ;;  %v1098_v63 = vmul.u32.u64.high %v416_v55, %v411_v58, %v1097_v62  ;;  %v423_v2 = vmul.u32 %v416_v55, %v407_v0 }
 0x153   : > { %v1094_v60 = vmul.u32.u64.low %v416_v55, %v415_v59  ;;  %v1095_v61 = vmul.u32.u64.high %v416_v55, %v415_v59, %v1094_v60 }
 0x154   : > { %v426_v1 = vadd.s32 1, %v1098_v63 }
 0x155   : > { %vm425_vm7 = vc.u32 %v1095_v61, %v1097_v62  ;;  %v424_v15 = vadd.s32 %v1097_v62, %v1095_v61 }
 0x156   : > { %v427_v3 = vsel %vm425_vm7, %v426_v1, %v1098_v63 }
 0x157   : > { %v428_v4 = vadd.s32 %v427_v3, %v423_v2 }
 0x159   : > { %v429_v5 = vadd.s32 536870912, %v428_v4 }
 0x15b   : > { %v430_v6 = vshrl.u32 %v429_v5, 30 }
 0x15d   : > { %v431_v7 = vshll.u32 %v430_v6, 30  ;;  %v454_v28 = vsub.s32 4, %v430_v6 }
 0x15f   : > { %v432_v8 = vsub.s32 %v428_v4, %v431_v7  ;;  %v455_v31 = vsel %vm370_vm9, %v454_v28, %v430_v6 }
 0x160   : > { %v457_v33 = vsel %vm369_vm10, 0, %v455_v31 }
 0x161   : > { %v434_v9 = vsub.s32 0, %v432_v8  ;;  %v461_v34 = vadd.s32 3, %v457_v33 }
 0x163   : > { %v611_v10 = vmin.u32 %v434_v9, %v432_v8  ;;  %v462_v35 = vand.u32 3, %v461_v34 }
 0x165   : > { %v436_v11 = vclz %v611_v10  ;;  %vm467_vm11 = vcmp.eq.s32.totalorder %v462_v35, 2  ;;  %vm464_vm12 = vcmp.eq.s32.totalorder %v462_v35, 0  ;;  %vm463_vm13 = vcmp.lt.s32.totalorder %v462_v35, 2 }
 0x167   : > { %v612_v12 = vadd.s32 4294967294, %v436_v11 }
 0x169   : > { %vm613_vm8 = vcmp.lt.s32.totalorder %v612_v12, 0 }
 0x16a   : > { %v439_v13 = vsel %vm613_vm8, 0, %v612_v12 }
 0x16b   : > { %v440_v16 = vsub.s32 32, %v439_v13  ;;  %v444_v17 = vsub.s32 4294967266, %v439_v13  ;;  %v441_v18 = vshll.u32 %v432_v8, %v439_v13 }
 0x16d   : > { %v442_v20 = vshrl.u32 %v424_v15, %v440_v16  ;;  %v445_v21 = vadd.s32 127, %v444_v17 }
 0x16f   : > { %v443_v22 = vor.u32 %v442_v20, %v441_v18  ;;  %v446_v23 = vshll.u32 %v445_v21, 23 }
 0x171   : > { %v447_v24 = vor.u32 4788187, %v446_v23  ;;  %v450_v26 = vcvt.s32.f32 %v443_v22 }
 0x173   : > { %v448_v25 = vand.u32 2147483647, %v447_v24 }
 0x175   : > { %v451_v27 = vmul.f32 %v450_v26, %v448_v25 }
 0x177   : > { %v452_v29 = vxor.u32 2147483648, %v451_v27 }
 0x179   : > { %v453_v30 = vsel %vm370_vm9, %v452_v29, %v451_v27 }
 0x17a   : > { %v456_v32 = vsel %vm369_vm10, %v1088_v14, %v453_v30 }
 0x17b   : > { %728 = vcosq.f32 %v456_v32 }
 0x17c   : > { %730 = vsinq.f32 %v456_v32 }
 0x185   : > { %v729_v36 = vpop.eup %728 }
 0x186   : > { %v731_v37 = vpop.eup %730  ;;  %v468_v38 = vxor.u32 2147483648, %v729_v36 }
 0x187   : > { %v465_v39 = vxor.u32 2147483648, %v731_v37 }
 0x188   : > { %v469_v19 = vsel %vm467_vm11, %v468_v38, %v731_v37 }
 0x189   : > { %v466_v40 = vsel %vm464_vm12, %v729_v36, %v465_v39 }
 0x18a   : > { %v470_v41 = vsel %vm463_vm13, %v466_v40, %v469_v19 }
 0x18b   : > { %v471_v42 = vsel %vm460_vm14, nan, %v470_v41 }
 0x18c   : > { %472 = vst [vmem:[%s266_s29] sm:$0xff] %v471_v42 }
 0x18d   : > { %803 = shalt.err (!%p800_p9)
}
 0x18e   : > { %s804_s6 = scalar_lea.hbm %s1115_s11, 128  ;;  %s808_s21 = scalar_lea.hbm %s1168_s4, 256 }
 0x18f   : > { %p805_p1 = scmp.ne.s32.totalorder %s1115_s11, %s804_s6  ;;  %p809_p3 = scmp.lt.u32.totalorder %s1115_s11, %s1168_s4 }
 0x190   : > { %p810_p13 = scmp.lt.u32.totalorder %s808_s21, %s804_s6  ;;  %p812_p6 = scmp.lt.u32.totalorder %s804_s6, %s1115_s11 }
 0x191   : > { %p806_p2 = pnand %p805_p1, %p1013_p10 }
 0x192   : > { %p811_p4 = por %p810_p13, %p809_p3 }
 0x193   : > { %p807_p7 = pneg %p806_p2 }
 0x194   : > { %p813_p8 = por %p812_p6, %p811_p4 }
 0x196   : > { %p814_p12 = pnand %p813_p8, %p807_p7 }
 0x198   : > { %817 = shalt.err (!%p814_p12)
}
 0x199   : > { %650 = dma.vmem_to_hbm [thread:$0]  (%p1013_p10), %s1117_s13, 128, %s1115_s11, %s474_s18  }
 0x19a PF: > { %s500_s12 = sand.u32 1, %s856_s15   ;;  %p1186_p11 = scmp.ne.s32.totalorder %s1176_s26, 0 }
 0x19b   : > { %p1187_p0 = scmp.ge.s32.totalorder %s876_s20, 2  ;;  %s501_s29 = scalar_lea.sflag [#allocation4], %s500_s12 }
 0x19d   : > { %p661_p5 = pnand %p1187_p0, %p1186_p11 }
 0x19f   : > { %851 = dma.done.wait (!%p661_p5), %s501_s29, 128  }
 0x1a0   : > { %853 = vsyncadd (!%p661_p5), %s501_s29, 4294967168  ;;  %s21_s20 = sadd.s32 1, %s876_s20   ;;  %s1188_s15 = smov %s860_s16 }
 0x1a1   : > { %p18_p9 = scmp.ge.s32.totalorder %s21_s20, 4   ;;  %s1189_s16 = smov %s864_s17 }
 0x1a2   : > { %s1190_s17 = smov %s1022_s10  ;;  %s1191_s18 = smov %s872_s19 }
 0x1a3   : > { %s1192_s19 = smov %s1194_s5  ;;  %20 = sbr.rel (!%p18_p9) target bundleno = 7 (0x7), region = 91 }
 0x1aa   :  { %506 = vsyncpa [#allocation3], 1 }
 0x1ab   :  { %508 = vsyncpa [#allocation3 + $0x1], 1 }
 0x1ac   :  { %509 = vsyncpa [#allocation6], 1 }
 0x1ad   :  { %510 = vsyncpa [#allocation4], 1 }
 0x1ae   :  { %512 = vsyncpa [#allocation4 + $0x1], 1 }

</bundles_post_ra>
